<compile_context>
chip_gen: v6e
topology: v6e:2x2x1
jax: 0.10.0
libtpu: 0.0.40
codegen_flags: <defaults>
</compile_context>

<pallas_src>
import jax
import jax.numpy as jnp
from jax.experimental import pallas as pl
from jax.experimental.pallas import tpu as pltpu

LANE = 128
SUBLANE = 8


def _round_up(n, m):
    return ((n + m - 1) // m) * m


def pack_params(params):
    """Pack (w1,b1,w2,b2,w3,b3) into one padded f32 slab plus a static layout.

    layout: tuple per layer of ((w_row0, w_rows, w_cols), (b_row0, b_cols)).
    """
    ws = params[0::2]
    bs = params[1::2]
    n_cols = _round_up(max(int(w.shape[1]) for w in ws), LANE)

    entries, layout = [], []
    row = 0
    for w in ws:
        entries.append((row, w))
        layout.append([(row, int(w.shape[0]), int(w.shape[1])), None])
        row += int(w.shape[0])
    row = _round_up(row, SUBLANE)               # bias rows start sublane-aligned
    for i, b in enumerate(bs):
        entries.append((row, b))
        layout[i][1] = (row, int(b.shape[1]))
        row += 1
    n_rows = _round_up(row, SUBLANE)

    slab = jnp.zeros((n_rows, n_cols), jnp.float32)
    for r0, arr in entries:
        slab = slab.at[r0:r0 + arr.shape[0], 0:arr.shape[1]].set(
            arr.astype(jnp.float32))
    return slab, tuple((tuple(lw), tuple(lb)) for lw, lb in layout)


def _make_mlp_kernel(layout, use_bf16):
    """Fused MLP kernel: ReLU between layers, no activation on the last one."""
    n_layers = len(layout)

    def kernel(x_ref, slab_ref, o_ref):
        h = x_ref[...]
        for li, ((wr, rows, cols), (br, bcols)) in enumerate(layout):
            w = slab_ref[wr:wr + rows, 0:cols]      # static slice of VMEM slab
            b = slab_ref[br:br + 1, 0:bcols]        # (1, cols) f32 bias
            if use_bf16:
                h = h.astype(jnp.bfloat16)
                w = w.astype(jnp.bfloat16)
            h = jnp.dot(h, w, preferred_element_type=jnp.float32) + b
            if li < n_layers - 1:
                h = jnp.maximum(h, 0.0)             # ReLU on hidden layers only
        o_ref[...] = h.astype(o_ref.dtype)

    return kernel


def representation_transformation(x, params, *, tb_max=2048, use_bf16=True):
    """y = MLP(x). x: [B, num_in] float32. params: (w1, b1, w2, b2, w3, b3)."""
    slab, layout = pack_params(params)
    B, num_in = x.shape
    num_out = int(params[-2].shape[1])

    # Batch tile: multiple of 8, large enough to amortize per-grid-step DMA /
    # MXU push overhead, small enough (<= 2048 rows -> <1 MiB double-buffered)
    # to fit comfortably under scoped VMEM on v5e/v6e/v7x.
    b8 = _round_up(max(B, SUBLANE), SUBLANE)
    tb = min(tb_max, b8)
    b_pad = _round_up(b8, tb)
    if b_pad != B:
        x = jnp.pad(x, ((0, b_pad - B), (0, 0)))

    kernel = _make_mlp_kernel(layout, use_bf16)
    out = pl.pallas_call(
        kernel,
        out_shape=jax.ShapeDtypeStruct((b_pad, num_out), jnp.float32),
        grid=(b_pad // tb,),
        in_specs=[
            pl.BlockSpec((tb, num_in), lambda i: (i, 0)),
            # Constant index_map -> weight slab DMA'd once, stays VMEM-resident.
            pl.BlockSpec(slab.shape, lambda i: (0, 0)),
        ],
        out_specs=pl.BlockSpec((tb, num_out), lambda i: (i, 0)),
        compiler_params=pltpu.CompilerParams(
            dimension_semantics=("parallel",),   # shard batch over v7x's 2 TCs
        ),
    )(x, slab)
    return out[:B]


def init_params(key, num_in=32, num_out=10):
    """Deterministic init mimicking PyTorch Linear default (uniform +/- 1/sqrt(fan_in))."""
    sizes = [(num_in, 128), (128, 32), (32, num_out)]
    params = []
    for i, (fin, fout) in enumerate(sizes):
        kw, kb = jax.random.split(jax.random.fold_in(key, i))
        bound = 1.0 / jnp.sqrt(fin)
        w = jax.random.uniform(kw, (fin, fout), jnp.float32, -bound, bound)
        b = jax.random.uniform(kb, (1, fout), jnp.float32, -bound, bound)
        params += [w, b]
    return tuple(params)


def reference_forward(x, params):
    w1, b1, w2, b2, w3, b3 = params
    h1 = jnp.maximum(x @ w1 + b1, 0.0)
    h2 = jnp.maximum(h1 @ w2 + b2, 0.0)
    return h2 @ w3 + b3


if __name__ == "__main__":
    key = jax.random.PRNGKey(0)
    k_x, k_p = jax.random.split(key)

    num_in, num_out = 32, 10
    params = init_params(k_p, num_in=num_in, num_out=num_out)

    # Small-batch path (single batch tile).
    x_small = jax.random.normal(k_x, (8, num_in), jnp.float32)
    out_small = jax.block_until_ready(representation_transformation(x_small, params))
    ref_small = reference_forward(x_small, params)
    assert out_small.shape == (8, num_out)
    # bf16 MXU operands with f32 accumulation -> relaxed tolerance vs f32 ref.
    assert jnp.allclose(out_small, ref_small, atol=3e-2, rtol=3e-2)

    # Multi-tile path: B=300 with 128-row tiles -> grid of 3, padded to 384.
    x_big = jax.random.normal(jax.random.fold_in(k_x, 1), (300, num_in), jnp.float32)
    out_big = jax.block_until_ready(
        representation_transformation(x_big, params, tb_max=128))
    ref_big = reference_forward(x_big, params)
    assert out_big.shape == (300, num_out)
    assert jnp.allclose(out_big, ref_big, atol=3e-2, rtol=3e-2)

    print("KERNEL_OK")
</pallas_src>

<mosaic_0001>
module attributes {stable_mosaic.version = 11 : i64} {
  func.func @kernel(%arg0: i32, %arg1: memref<8x32xf32, #tpu.memory_space<vmem>>, %arg2: memref<200x128xf32, #tpu.memory_space<vmem>>, %arg3: memref<8x10xf32, #tpu.memory_space<vmem>>) attributes {dimension_semantics = [#tpu.dimension_semantics<parallel>], iteration_bounds = array<i64: 1>, scalar_prefetch = 0 : i64, scratch_operands = 0 : i64, tpu.core_type = #tpu.core_type<tc>, window_params = [{transform_indices = @transform_0, window_bounds = array<i64: 8, 32>}, {pipeline_mode = #tpu.pipeline_mode<synchronous>, transform_indices = @transform_1, window_bounds = array<i64: 200, 128>}, {transform_indices = @transform_2, window_bounds = array<i64: 8, 10>}]} {
    %c0 = arith.constant 0 : index
    %c0_0 = arith.constant 0 : index
    %0 = vector.load %arg1[%c0, %c0_0] : memref<8x32xf32, #tpu.memory_space<vmem>>, vector<8x32xf32>
    %c0_1 = arith.constant 0 : index
    %c0_2 = arith.constant 0 : index
    %1 = vector.load %arg2[%c0_1, %c0_2] : memref<200x128xf32, #tpu.memory_space<vmem>>, vector<32x128xf32>
    %c192 = arith.constant 192 : index
    %c0_3 = arith.constant 0 : index
    %2 = vector.load %arg2[%c192, %c0_3] : memref<200x128xf32, #tpu.memory_space<vmem>>, vector<1x128xf32>
    %3 = arith.truncf %0 : vector<8x32xf32> to vector<8x32xbf16>
    %4 = arith.truncf %1 : vector<32x128xf32> to vector<32x128xbf16>
    %cst = arith.constant dense<0.000000e+00> : vector<8x128xf32>
    %5 = tpu.matmul %3, %4, %cst {dimension_numbers = #tpu.dot_dimension_numbers<[1], [0], [0], [1], [0, 0, 1, 1], [], []>} : vector<8x32xbf16>, vector<32x128xbf16>, vector<8x128xf32> -> vector<8x128xf32>
    %6 = vector.broadcast %2 : vector<1x128xf32> to vector<8x128xf32>
    %7 = arith.addf %5, %6 : vector<8x128xf32>
    %cst_4 = arith.constant 0.000000e+00 : f32
    %8 = vector.broadcast %cst_4 : f32 to vector<8x128xf32>
    %9 = arith.maximumf %7, %8 : vector<8x128xf32>
    %c32 = arith.constant 32 : index
    %c0_5 = arith.constant 0 : index
    %10 = vector.load %arg2[%c32, %c0_5] : memref<200x128xf32, #tpu.memory_space<vmem>>, vector<128x32xf32>
    %c193 = arith.constant 193 : index
    %c0_6 = arith.constant 0 : index
    %11 = vector.load %arg2[%c193, %c0_6] : memref<200x128xf32, #tpu.memory_space<vmem>>, vector<1x32xf32>
    %12 = arith.truncf %9 : vector<8x128xf32> to vector<8x128xbf16>
    %13 = arith.truncf %10 : vector<128x32xf32> to vector<128x32xbf16>
    %cst_7 = arith.constant dense<0.000000e+00> : vector<8x32xf32>
    %14 = tpu.matmul %12, %13, %cst_7 {dimension_numbers = #tpu.dot_dimension_numbers<[1], [0], [0], [1], [0, 0, 1, 1], [], []>} : vector<8x128xbf16>, vector<128x32xbf16>, vector<8x32xf32> -> vector<8x32xf32>
    %15 = vector.broadcast %11 : vector<1x32xf32> to vector<8x32xf32>
    %16 = arith.addf %14, %15 : vector<8x32xf32>
    %cst_8 = arith.constant 0.000000e+00 : f32
    %17 = vector.broadcast %cst_8 : f32 to vector<8x32xf32>
    %18 = arith.maximumf %16, %17 : vector<8x32xf32>
    %c160 = arith.constant 160 : index
    %c0_9 = arith.constant 0 : index
    %19 = vector.load %arg2[%c160, %c0_9] : memref<200x128xf32, #tpu.memory_space<vmem>>, vector<32x10xf32>
    %c194 = arith.constant 194 : index
    %c0_10 = arith.constant 0 : index
    %20 = vector.load %arg2[%c194, %c0_10] : memref<200x128xf32, #tpu.memory_space<vmem>>, vector<1x10xf32>
    %21 = arith.truncf %18 : vector<8x32xf32> to vector<8x32xbf16>
    %22 = arith.truncf %19 : vector<32x10xf32> to vector<32x10xbf16>
    %cst_11 = arith.constant dense<0.000000e+00> : vector<8x10xf32>
    %23 = tpu.matmul %21, %22, %cst_11 {dimension_numbers = #tpu.dot_dimension_numbers<[1], [0], [0], [1], [0, 0, 1, 1], [], []>} : vector<8x32xbf16>, vector<32x10xbf16>, vector<8x10xf32> -> vector<8x10xf32>
    %24 = vector.broadcast %20 : vector<1x10xf32> to vector<8x10xf32>
    %25 = arith.addf %23, %24 : vector<8x10xf32>
    %c0_12 = arith.constant 0 : index
    %c0_13 = arith.constant 0 : index
    %26 = vector.load %arg3[%c0_12, %c0_13] : memref<8x10xf32, #tpu.memory_space<vmem>>, vector<8x10xf32>
    tpu.vector_store %arg3[%c0_12, %c0_13], %25 {strides = array<i32>} : memref<8x10xf32, #tpu.memory_space<vmem>>, vector<8x10xf32>,
    return
  }
  func.func @transform_0(%arg0: i32) -> (i32, i32) {
    %c0_i32 = arith.constant 0 : i32
    %c0_i32_0 = arith.constant 0 : i32
    return %arg0, %c0_i32 : i32, i32
  }
  func.func @transform_1(%arg0: i32) -> (i32, i32) {
    %c0_i32 = arith.constant 0 : i32
    %c0_i32_0 = arith.constant 0 : i32
    %c0_i32_1 = arith.constant 0 : i32
    return %c0_i32, %c0_i32_0 : i32, i32
  }
  func.func @transform_2(%arg0: i32) -> (i32, i32) {
    %c0_i32 = arith.constant 0 : i32
    %c0_i32_0 = arith.constant 0 : i32
    return %arg0, %c0_i32 : i32, i32
  }
}

</mosaic_0001>

<bundles_post_ra>
// kernel: tpu_custom_call.1
= control target key start
LH: loop header
LB: loop body
LE: loop exit
PB: predicated region body
PF: predicated region fallthrough
CT: control target
= control target key end

     0   :  { %7 = vsyncpa [#allocation3], 0  ;;  %s421_s0 = inlined_call_operand.hbm [shape: f32[8,32], index: 0, kind: input, shape index: {}]   ;;  %s422_s1 = inlined_call_operand.hbm [shape: f32[200,128], index: 1, kind: input, shape index: {}]   ;;  %s423_s2 = inlined_call_operand.hbm [shape: f32[8,10], index: 2, kind: output, shape index: {}]  }
   0x1   :  { %8 = vsyncpa [#allocation6], 0 }
   0x2   :  { %9 = vsyncpa [#allocation4], 0  ;;  %s370_s9 = smov [#allocation2]   ;;  %s371_s11 = smov [#allocation5]  }
   0x3   :  { %s16_s10 = sshll.u32 %s370_s9, 4  ;;  %s25_s12 = sshll.u32 %s371_s11, 4  ;;  %s17_s10 = int_to_ptr.vmem [resolvable:$true] %s16_s10  ;;  %s26_s12 = int_to_ptr.vmem [resolvable:$true] %s25_s12 }
   0x4   :  { %s312_s13 = scalar_lea.vmem %s17_s10, 128  ;;  %p317_p1 = scmp.lt.s32.totalorder %s17_s10, %s17_s10 }
   0x5   :  { %p313_p0 = scmp.ne.s32.totalorder %s17_s10, %s312_s13  ;;  %p318_p2 = scmp.lt.s32.totalorder %s312_s13, %s312_s13 }
   0x7   :  { %p319_p3 = por %p318_p2, %p317_p1 }
   0x9   :  { %p320_p4 = pnand %p319_p3, %p313_p0 }
   0xb   :  { %323 = shalt.err (!%p320_p4)
}
   0xc   :  { %19 = dma.hbm_to_vmem [thread:$0]  %s421_s0, 128, %s17_s10, [#allocation3]  }
   0xd   :  { %s332_s16 = scalar_lea.vmem %s26_s12, 3200  ;;  %p337_p6 = scmp.lt.s32.totalorder %s26_s12, %s26_s12 }
   0xe   :  { %p333_p5 = scmp.ne.s32.totalorder %s26_s12, %s332_s16  ;;  %p338_p7 = scmp.lt.s32.totalorder %s332_s16, %s332_s16 }
  0x10   :  { %p339_p8 = por %p338_p7, %p337_p6 }
  0x12   :  { %p340_p9 = pnand %p339_p8, %p333_p5 }
  0x14   :  { %343 = shalt.err (!%p340_p9)
}
  0x15   :  { %s372_s17 = smov 128   ;;  %s373_s18 = smov 8  }
  0x16   :  { %31 = dma.hbm_to_vmem [thread:$0]  %s422_s1, 3200, %s26_s12, [#allocation6], %s372_s17, %s372_s17, %s373_s18  }
  0x17   :  { %364 = dma.done.wait [#allocation3], 128  }
  0x18   :  { %365 = vsyncadd [#allocation3], 4294967168 }
  0x19   :  { %366 = dma.done.wait [#allocation6], 3200  }
  0x1a   :  { %367 = vsyncadd [#allocation6], 4294964096  ;;  %v374_v0 = vmov 0.0   ;;  %vm375_vm0 = vmmov 0   ;;  %v42_v1 = vld [vmem:[#allocation5 + $0x10] sm:$0xff]  ;;  %v43_v2 = vld [vmem:[#allocation5 + $0x18] sm:$0xff] }
  0x1b   :  { %261 = vmatprep.subr.bf16.mxu0 %v374_v0  ;;  %265 = vmatprep.mubr.msk.bf16.mxu0 %vm375_vm0, %v374_v0  ;;  %v40_v3 = vld [vmem:[#allocation5] sm:$0xff]  ;;  %v47_v4 = vpack.c.bf16 %v43_v2, %v42_v1  ;;  %v41_v5 = vld [vmem:[#allocation5 + $0x8] sm:$0xff]  ;;  %v111_v6 = vld [vmem:[#allocation5 + $0x90] sm:$0xff]  ;;  %vm52_vm1 = vcmask 261120   ;;  %s376_s0 = smov [#allocation7]   ;;  %vm223_vm2 = vcmask 80896  }
  0x1c   :  { %269 = vmatprep.subr.bf16.mxu1 %v374_v0  ;;  %285 = vmatprep.mubr.msk.bf16.mxu1 %vm375_vm0, %v374_v0  ;;  %v112_v7 = vld [vmem:[#allocation5 + $0x98] sm:$0xff]  ;;  %v109_v8 = vld [vmem:[#allocation5 + $0x80] sm:$0xff]  ;;  %v110_v9 = vld [vmem:[#allocation5 + $0x88] sm:$0xff]  ;;  %v46_v10 = vpack.c.bf16 %v41_v5, %v40_v3  ;;  %s231_s1 = sshll.u32 %s376_s0, 4  ;;  %s232_s1 = int_to_ptr.vmem [resolvable:$true] %s231_s1 }
  0x1d   :  { %262 = vmatpush3.bf16.msra.mxu0 %v47_v4  ;;  %v39_v11 = vld [vmem:[#allocation2] sm:$0xff]  ;;  %v122_v12 = vpack.c.bf16 %v112_v7, %v111_v6  ;;  %v121_v13 = vpack.c.bf16 %v110_v9, %v109_v8  ;;  %v107_v15 = vld [vmem:[#allocation5 + $0x70] sm:$0xff]  ;;  %v105_v18 = vld [vmem:[#allocation5 + $0x60] sm:$0xff]  ;;  %s344_s21 = scalar_lea.vmem %s232_s1, 128  ;;  %p349_p11 = scmp.lt.s32.totalorder %s232_s1, %s232_s1 }
  0x1e   :  { %263 = vmatprep.subr.bf16.mxu0 %v374_v0  ;;  %v45_v14 = vpack.c.bf16 %v39_v11, %v39_v11  ;;  %v108_v16 = vld [vmem:[#allocation5 + $0x78] sm:$0xff]  ;;  %v106_v19 = vld [vmem:[#allocation5 + $0x68] sm:$0xff]  ;;  %v103_v21 = vld [vmem:[#allocation5 + $0x50] sm:$0xff]  ;;  %p345_p10 = scmp.ne.s32.totalorder %s232_s1, %s344_s21  ;;  %p350_p12 = scmp.lt.s32.totalorder %s344_s21, %s344_s21 }
  0x1f   :  { %270 = vmatpush3.bf16.msra.mxu1 %v122_v12  ;;  %v120_v17 = vpack.c.bf16 %v108_v16, %v107_v15  ;;  %v119_v20 = vpack.c.bf16 %v106_v19, %v105_v18  ;;  %v104_v22 = vld [vmem:[#allocation5 + $0x58] sm:$0xff]  ;;  %v101_v24 = vld [vmem:[#allocation5 + $0x40] sm:$0xff]  ;;  %v102_v25 = vld [vmem:[#allocation5 + $0x48] sm:$0xff] }
  0x20   :  { %271 = vmatprep.subr.bf16.mxu1 %v374_v0  ;;  %v118_v23 = vpack.c.bf16 %v104_v22, %v103_v21  ;;  %v117_v26 = vpack.c.bf16 %v102_v25, %v101_v24  ;;  %v99_v27 = vld [vmem:[#allocation5 + $0x30] sm:$0xff]  ;;  %v100_v28 = vld [vmem:[#allocation5 + $0x38] sm:$0xff]  ;;  %v97_v30 = vld [vmem:[#allocation5 + $0x20] sm:$0xff]  ;;  %p351_p13 = por %p350_p12, %p349_p11 }
  0x21   :  { %264 = vmatpush3.bf16.msra.mxu0 %v46_v10  ;;  %v116_v29 = vpack.c.bf16 %v100_v28, %v99_v27  ;;  %v98_v31 = vld [vmem:[#allocation5 + $0x28] sm:$0xff]  ;;  %v170_v33 = vld [vmem:[#allocation5 + $0xb0] sm:$0xff]  ;;  %v171_v34 = vld [vmem:[#allocation5 + $0xb8] sm:$0xff] }
  0x22   :  { %289 = vmatprep.subr.bf16.mxu0 %v374_v0  ;;  %v115_v32 = vpack.c.bf16 %v98_v31, %v97_v30  ;;  %v175_v35 = vpack.c.bf16 %v171_v34, %v170_v33  ;;  %v241_v36 = vld [vmem:[#allocation5 + $0xc0] ss:$0 sm:$0xff]  ;;  %v169_v45 = vld [vmem:[#allocation5 + $0xa8] sm:$0xff]  ;;  %v243_v47 = vld [vmem:[#allocation5 + $0xc1] ss:$0 sm:$0xff]  ;;  %p352_p0 = pnand %p351_p13, %p345_p10 }
  0x23   :  { %272 = vmatpush3.bf16.msra.mxu1 %v121_v13  ;;  %v168_v44 = vld [vmem:[#allocation5 + $0xa0] sm:$0xff] }
  0x24   :  { %266 = vmatmul.mubr.msk.bf16.vlgmr.msra.gmra.mxu0 %vm52_vm1, %v45_v14  ;;  %273 = vmatprep.subr.bf16.mxu1 %v374_v0  ;;  %v174_v46 = vpack.c.bf16 %v169_v45, %v168_v44  ;;  %v244_v55 = vld [vmem:[#allocation5 + $0xc2] ss:$0 sm:$0xff] }
  0x25   :  { %293 = vmatprep.mubr.msk.bf16.mxu0 %vm375_vm0, %v374_v0  ;;  %290 = vmatpush3.bf16.msra.mxu0 %v175_v35 }
  0x26   :  { %291 = vmatprep.subr.bf16.mxu0 %v374_v0 }
  0x27   :  { %274 = vmatpush3.bf16.msra.mxu1 %v120_v17 }
  0x28   :  { %275 = vmatprep.subr.bf16.mxu1 %v374_v0 }
  0x29   :  { %292 = vmatpush3.bf16.msra.mxu0 %v174_v46 }
  0x2b   :  { %276 = vmatpush3.bf16.msra.mxu1 %v119_v20 }
  0x2c   :  { %277 = vmatprep.subr.bf16.mxu1 %v374_v0 }
  0x2f   :  { %278 = vmatpush3.bf16.msra.mxu1 %v118_v23 }
  0x30   :  { %279 = vmatprep.subr.bf16.mxu1 %v374_v0 }
  0x33   :  { %280 = vmatpush3.bf16.msra.mxu1 %v117_v26 }
  0x34   :  { %281 = vmatprep.subr.bf16.mxu1 %v374_v0 }
  0x37   :  { %282 = vmatpush3.bf16.msra.mxu1 %v116_v29 }
  0x38   :  { %283 = vmatprep.subr.bf16.mxu1 %v374_v0 }
  0x3b   :  { %284 = vmatpush3.bf16.msra.mxu1 %v115_v32 }
  0xe4   :  { %v90_v37 = vpop.f32.mrf.mxu0 }
  0xe5   :  { %v91_v38 = vadd.f32 %v241_v36, %v90_v37 }
  0xe6   :  { %v267_v39 = vpop.f32.mrf.mxu0 }
  0xe7   :  { %v96_v40 = vmax.f32 %v91_v38, 0.0 }
  0xe8   :  { %v93_v41 = vpop.f32.mrf.mxu0 }
  0xe9   :  { %v114_v42 = vpack.c.bf16 %v96_v40, %v96_v40 }
  0xea   :  { %v268_v43 = vpop.f32.mrf.mxu0 }
  0xeb   :  { %286 = vmatmul.mubr.bf16.vlgmr.msra.gmra.mxu1 %v114_v42 }
 0x1ab   :  { %v161_v48 = vpop.f32.mrf.mxu1 }
 0x1ac   :  { %v162_v49 = vadd.f32 %v243_v47, %v161_v48 }
 0x1ad   :  { %v287_v50 = vpop.f32.mrf.mxu1 }
 0x1ae   :  { %v167_v51 = vmax.f32 %v162_v49, 0.0 }
 0x1af   :  { %v164_v52 = vpop.f32.mrf.mxu1 }
 0x1b0   :  { %v173_v53 = vpack.c.bf16 %v167_v51, %v167_v51 }
 0x1b1   :  { %v288_v54 = vpop.f32.mrf.mxu1 }
 0x1b2   :  { %294 = vmatmul.mubr.msk.bf16.vlgmr.msra.gmra.mxu0 %vm52_vm1, %v173_v53 }
 0x272   :  { %v217_v56 = vpop.f32.mrf.mxu0 }
 0x273   :  { %v218_v57 = vadd.f32 %v244_v55, %v217_v56 }
 0x274   :  { %v295_v58 = vpop.f32.mrf.mxu0 }
 0x275   :  { %224 = vst.msk [vmem:[#allocation7] sm:$0xff] %vm223_vm2, %v218_v57 }
 0x276   :  { %v220_v59 = vpop.f32.mrf.mxu0 }
 0x277   :  { %355 = shalt.err (!%p352_p0)
}
 0x278   :  { %234 = dma.vmem_to_hbm [thread:$0]  %s232_s1, 128, %s423_s2, [#allocation4]   ;;  %v296_v60 = vpop.f32.mrf.mxu0 }
 0x279   :  { %368 = dma.done.wait [#allocation4], 128  }
 0x27a   :  { %369 = vsyncadd [#allocation4], 4294967168 }
 0x27b   :  { %238 = vsyncpa [#allocation3], 1 }
 0x27c   :  { %239 = vsyncpa [#allocation6], 1 }
 0x27d   :  { %240 = vsyncpa [#allocation4], 1 }

</bundles_post_ra>
